<compile_context>
chip_gen: v7x
topology: tpu7x:2x2x1
jax: 0.10.0
libtpu: 0.0.40
codegen_flags: <defaults>
</compile_context>

<pallas_src>
import jax
import jax.numpy as jnp
from jax import lax
from jax.experimental import pallas as pl
from jax.experimental.pallas import tpu as pltpu

# --- Problem dimensions (Parameter.* stand-ins, small & deterministic) -------
ROW_DIM = 8
COLUMN_DIM = 8
NUM_OF_COLOR = 4
CONV_OUT = 54
FC1_OUT = 128
MAX_POSSIBLE_MOVE = ROW_DIM * (COLUMN_DIM - 1)   # 56
HW = ROW_DIM * COLUMN_DIM                        # 64
K_IM2COL = NUM_OF_COLOR * 9                      # 36
OUT_PAD = 128                                    # 56 -> 128 (lane-dense output)

GROUP = 8                                        # positions per grid step (= 1 image row)
NG = HW // GROUP                                 # 8 grid steps (fc1 reduction chunks)
GK = GROUP * K_IM2COL                            # 288  per-step im2col width
GC = GROUP * CONV_OUT                            # 432  per-step conv / fc1-chunk width


# --- Fused Pallas kernel ------------------------------------------------------
def fused_net_kernel(patch_ref, wcg_ref, bcg_ref, w1_ref, b1_ref, w3_ref, b3_ref,
                     out_ref, h_acc):
    g = pl.program_id(0)

    @pl.when(g == 0)
    def _init():
        h_acc[...] = jnp.zeros_like(h_acc)

    # conv1 for this row of GROUP positions.  The block-diagonal weight makes
    # the output land directly in fc1's (position-major, channel-minor) layout:
    # conv[b, j*CONV_OUT + c] for local position j.  bf16 x bf16, f32 accumulate.
    conv = jnp.dot(patch_ref[...], wcg_ref[...],
                   preferred_element_type=jnp.float32)         # (B, GC)
    conv = jnp.maximum(conv + bcg_ref[...], 0.0)

    # Partial fc1 contraction against this step's (pipelined) chunk of w1 rows.
    h_acc[...] += jnp.dot(conv.astype(jnp.bfloat16), w1_ref[...],
                          preferred_element_type=jnp.float32)  # (B, 128)

    @pl.when(g == pl.num_programs(0) - 1)
    def _finish():
        h = jnp.maximum(h_acc[...] + b1_ref[...], 0.0)          # (B, 128)
        logits = jnp.dot(h.astype(jnp.bfloat16), w3_ref[...],
                         preferred_element_type=jnp.float32)
        logits = jnp.maximum(logits + b3_ref[...], 0.0)         # (B, OUT_PAD)
        # Padded columns get -inf so they vanish in softmax (valid max >= 0
        # thanks to the preceding ReLU).
        col = lax.broadcasted_iota(jnp.int32, logits.shape, 1)
        logits = jnp.where(col < MAX_POSSIBLE_MOVE, logits, -jnp.inf)
        m = jnp.max(logits, axis=-1, keepdims=True)
        e = jnp.exp(logits - m)
        out_ref[...] = e / jnp.sum(e, axis=-1, keepdims=True)   # exact: rows sum to 1


# --- Wrapper ------------------------------------------------------------------
def net_forward(x_nchw, kparams):
    """Forward pass. `kparams` must come from prepare_params()."""
    wcg, bcg, w1g, b1k, w3k, b3k = kparams
    B = x_nchw.shape[0]

    # im2col via an identity-kernel grouped conv: (B, H, W, C*9) with feature
    # order (c, kh, kw) == PyTorch's (O, C, 3, 3) weight flatten (validated by
    # the reference check below).  Then group positions row-by-row and cast to
    # bf16 (halves the per-sample HBM stream).
    patches = lax.conv_general_dilated_patches(
        x_nchw, (3, 3), (1, 1), ((1, 1), (1, 1)),
        dimension_numbers=("NCHW", "OIHW", "NHWC"))
    patches = patches.reshape(B, HW, K_IM2COL)
    patches = (patches.reshape(B, NG, GROUP, K_IM2COL)
               .transpose(1, 0, 2, 3)
               .reshape(NG, B, GK)
               .astype(jnp.bfloat16))                            # (NG, B, GK)

    grid_spec = pltpu.PrefetchScalarGridSpec(
        num_scalar_prefetch=0,
        grid=(NG,),
        in_specs=[
            # per-step row of im2col patches
            pl.BlockSpec((None, B, GK), lambda g: (g, 0, 0)),
            # block-diagonal conv weight + tiled bias: resident (constant index)
            pl.BlockSpec((GK, GC), lambda g: (0, 0)),
            pl.BlockSpec((1, GC), lambda g: (0, 0)),
            # fc1 weight chunk: pipelined over the reduction grid
            pl.BlockSpec((None, GC, FC1_OUT), lambda g: (g, 0, 0)),
            pl.BlockSpec((1, FC1_OUT), lambda g: (0, 0)),
            # fc3 weight / bias: resident
            pl.BlockSpec((FC1_OUT, OUT_PAD), lambda g: (0, 0)),
            pl.BlockSpec((1, OUT_PAD), lambda g: (0, 0)),
        ],
        out_specs=pl.BlockSpec((B, OUT_PAD), lambda g: (0, 0)),
        scratch_shapes=[pltpu.VMEM((B, FC1_OUT), jnp.float32)],
    )
    out = pl.pallas_call(
        fused_net_kernel,
        out_shape=jax.ShapeDtypeStruct((B, OUT_PAD), jnp.float32),
        grid_spec=grid_spec,
        compiler_params=pltpu.CompilerParams(dimension_semantics=("arbitrary",)),
    )(patches, wcg, bcg, w1g, b1k, w3k, b3k)
    return out[:, :MAX_POSSIBLE_MOVE]


# --- One-time parameter re-layout (permute / block-diag / pad / bf16) ---------
def prepare_params(params):
    w_conv, b_conv, w1, b1, w3, b3 = params
    # conv: (54, C, 3, 3) -> (C*9, 54), then replicate block-diagonally over the
    # GROUP positions handled per grid step: (GROUP*36, GROUP*54).
    wc = w_conv.reshape(CONV_OUT, K_IM2COL).T                       # (36, 54)
    eye = jnp.eye(GROUP, dtype=wc.dtype)
    wcg = jnp.einsum("ij,kc->ikjc", eye, wc).reshape(GK, GC).astype(jnp.bfloat16)
    bcg = jnp.tile(b_conv, (GROUP,)).reshape(1, GC)                 # f32
    # fc1: PyTorch input index is o*HW + p (NCHW flatten).  Kernel chunk g uses
    # rows ordered (local position j, channel o): index j*CONV_OUT + o.
    w1_pof = jnp.transpose(w1.reshape(FC1_OUT, CONV_OUT, HW), (2, 1, 0))  # (HW, 54, 128)
    w1g = w1_pof.reshape(NG, GC, FC1_OUT).astype(jnp.bfloat16)      # (8, 432, 128)
    b1k = b1.reshape(1, FC1_OUT)
    # fc3: transpose + pad output lanes 56 -> 128 (padded logits get masked).
    w3k = jnp.pad(w3.T, ((0, 0), (0, OUT_PAD - MAX_POSSIBLE_MOVE))).astype(jnp.bfloat16)
    b3k = jnp.pad(b3, (0, OUT_PAD - MAX_POSSIBLE_MOVE)).reshape(1, OUT_PAD)
    return (wcg, bcg, w1g, b1k, w3k, b3k)


# --- Deterministic parameter init (PyTorch-style uniform fan-in bounds) -------
def init_params(key):
    ks = jax.random.split(key, 6)
    fc1_in = CONV_OUT * HW
    k_conv = 1.0 / jnp.sqrt(NUM_OF_COLOR * 9.0)
    k_fc1 = 1.0 / jnp.sqrt(float(fc1_in))
    k_fc3 = 1.0 / jnp.sqrt(float(FC1_OUT))
    w_conv = jax.random.uniform(ks[0], (CONV_OUT, NUM_OF_COLOR, 3, 3),
                                jnp.float32, -k_conv, k_conv)
    b_conv = jax.random.uniform(ks[1], (CONV_OUT,), jnp.float32, -k_conv, k_conv)
    w1 = jax.random.uniform(ks[2], (FC1_OUT, fc1_in), jnp.float32, -k_fc1, k_fc1)
    b1 = jax.random.uniform(ks[3], (FC1_OUT,), jnp.float32, -k_fc1, k_fc1)
    w3 = jax.random.uniform(ks[4], (MAX_POSSIBLE_MOVE, FC1_OUT),
                            jnp.float32, -k_fc3, k_fc3)
    b3 = jax.random.uniform(ks[5], (MAX_POSSIBLE_MOVE,), jnp.float32, -k_fc3, k_fc3)
    return (w_conv, b_conv, w1, b1, w3, b3)


# --- Pure-JAX f32 reference (original module semantics) -----------------------
def net_forward_ref(x, params):
    w_conv, b_conv, w1, b1, w3, b3 = params
    conv = lax.conv_general_dilated(
        x, w_conv, window_strides=(1, 1), padding="SAME",
        dimension_numbers=("NCHW", "OIHW", "NCHW"))
    conv = jnp.maximum(conv + b_conv[None, :, None, None], 0.0)
    h = jnp.maximum(conv.reshape(x.shape[0], -1) @ w1.T + b1, 0.0)
    logits = jnp.maximum(h @ w3.T + b3, 0.0)
    return jax.nn.softmax(logits, axis=1)


if __name__ == "__main__":
    key = jax.random.PRNGKey(0)
    k_x, k_p = jax.random.split(key)
    x = jax.random.normal(k_x, (2, NUM_OF_COLOR, ROW_DIM, COLUMN_DIM), jnp.float32)
    params = init_params(k_p)
    kparams = prepare_params(params)      # one-time layout / block-diag / bf16 prep

    fwd = jax.jit(net_forward)
    probs = jax.block_until_ready(fwd(x, kparams))
    ref = net_forward_ref(x, params)

    assert probs.shape == (2, MAX_POSSIBLE_MOVE)
    # Exact softmax division -> rows sum to 1 to f32 rounding.
    assert jnp.allclose(jnp.sum(probs, axis=1), 1.0, atol=1e-4)
    # bf16 matmul operands introduce small, bounded deltas vs the exact f32
    # reference; softmax damps them further.
    assert jnp.allclose(probs, ref, atol=3e-3, rtol=3e-2)
    print("KERNEL_OK")
</pallas_src>

<mosaic_0001>
module attributes {stable_mosaic.version = 11 : i64} {
  func.func @fused_net_kernel(%arg0: i32, %arg1: memref<1x2x288xbf16, #tpu.memory_space<vmem>>, %arg2: memref<288x432xbf16, #tpu.memory_space<vmem>>, %arg3: memref<1x432xf32, #tpu.memory_space<vmem>>, %arg4: memref<1x432x128xbf16, #tpu.memory_space<vmem>>, %arg5: memref<1x128xf32, #tpu.memory_space<vmem>>, %arg6: memref<128x128xbf16, #tpu.memory_space<vmem>>, %arg7: memref<1x128xf32, #tpu.memory_space<vmem>>, %arg8: memref<2x128xf32, #tpu.memory_space<vmem>>, %arg9: memref<2x128xf32, #tpu.memory_space<vmem>>) attributes {dimension_semantics = [#tpu.dimension_semantics<arbitrary>], iteration_bounds = array<i64: 8>, scalar_prefetch = 0 : i64, scratch_operands = 1 : i64, tpu.core_type = #tpu.core_type<tc>, window_params = [{transform_indices = @transform_0, window_bounds = array<i64: 1, 2, 288>}, {pipeline_mode = #tpu.pipeline_mode<synchronous>, transform_indices = @transform_1, window_bounds = array<i64: 288, 432>}, {pipeline_mode = #tpu.pipeline_mode<synchronous>, transform_indices = @transform_2, window_bounds = array<i64: 1, 432>}, {transform_indices = @transform_3, window_bounds = array<i64: 1, 432, 128>}, {pipeline_mode = #tpu.pipeline_mode<synchronous>, transform_indices = @transform_4, window_bounds = array<i64: 1, 128>}, {pipeline_mode = #tpu.pipeline_mode<synchronous>, transform_indices = @transform_5, window_bounds = array<i64: 128, 128>}, {pipeline_mode = #tpu.pipeline_mode<synchronous>, transform_indices = @transform_6, window_bounds = array<i64: 1, 128>}, {pipeline_mode = #tpu.pipeline_mode<synchronous>, transform_indices = @transform_7, window_bounds = array<i64: 2, 128>}]} {
    %c0_i32 = arith.constant 0 : i32
    %0 = arith.cmpi eq, %arg0, %c0_i32 : i32
    %1 = arith.extui %0 : i1 to i32
    %c0_i32_0 = arith.constant 0 : i32
    %2 = arith.cmpi ne, %1, %c0_i32_0 : i32
    scf.if %2 {
      %cst_17 = arith.constant 0.000000e+00 : f32
      %22 = vector.broadcast %cst_17 : f32 to vector<2x128xf32>
      %c0_18 = arith.constant 0 : index
      %c0_19 = arith.constant 0 : index
      %23 = vector.load %arg9[%c0_18, %c0_19] : memref<2x128xf32, #tpu.memory_space<vmem>>, vector<2x128xf32>
      tpu.vector_store %arg9[%c0_18, %c0_19], %22 {strides = array<i32>} : memref<2x128xf32, #tpu.memory_space<vmem>>, vector<2x128xf32>,
    } else {
    }
    %c0 = arith.constant 0 : index
    %c0_1 = arith.constant 0 : index
    %c0_2 = arith.constant 0 : index
    %3 = vector.load %arg1[%c0, %c0_1, %c0_2] : memref<1x2x288xbf16, #tpu.memory_space<vmem>>, vector<1x2x288xbf16>
    %4 = vector.shape_cast %3 : vector<1x2x288xbf16> to vector<2x288xbf16>
    %c0_3 = arith.constant 0 : index
    %c0_4 = arith.constant 0 : index
    %5 = vector.load %arg2[%c0_3, %c0_4] : memref<288x432xbf16, #tpu.memory_space<vmem>>, vector<288x432xbf16>
    %cst = arith.constant dense<0.000000e+00> : vector<2x432xf32>
    %6 = tpu.matmul %4, %5, %cst {dimension_numbers = #tpu.dot_dimension_numbers<[1], [0], [0], [1], [0, 0, 1, 1], [], []>} : vector<2x288xbf16>, vector<288x432xbf16>, vector<2x432xf32> -> vector<2x432xf32>
    %c0_5 = arith.constant 0 : index
    %c0_6 = arith.constant 0 : index
    %7 = vector.load %arg3[%c0_5, %c0_6] : memref<1x432xf32, #tpu.memory_space<vmem>>, vector<1x432xf32>
    %8 = vector.broadcast %7 : vector<1x432xf32> to vector<2x432xf32>
    %9 = arith.addf %6, %8 : vector<2x432xf32>
    %cst_7 = arith.constant 0.000000e+00 : f32
    %10 = vector.broadcast %cst_7 : f32 to vector<2x432xf32>
    %11 = arith.maximumf %9, %10 : vector<2x432xf32>
    %c0_8 = arith.constant 0 : index
    %c0_9 = arith.constant 0 : index
    %12 = vector.load %arg9[%c0_8, %c0_9] : memref<2x128xf32, #tpu.memory_space<vmem>>, vector<2x128xf32>
    %13 = arith.truncf %11 : vector<2x432xf32> to vector<2x432xbf16>
    %c0_10 = arith.constant 0 : index
    %c0_11 = arith.constant 0 : index
    %c0_12 = arith.constant 0 : index
    %14 = vector.load %arg4[%c0_10, %c0_11, %c0_12] : memref<1x432x128xbf16, #tpu.memory_space<vmem>>, vector<1x432x128xbf16>
    %15 = vector.shape_cast %14 : vector<1x432x128xbf16> to vector<432x128xbf16>
    %cst_13 = arith.constant dense<0.000000e+00> : vector<2x128xf32>
    %16 = tpu.matmul %13, %15, %cst_13 {dimension_numbers = #tpu.dot_dimension_numbers<[1], [0], [0], [1], [0, 0, 1, 1], [], []>} : vector<2x432xbf16>, vector<432x128xbf16>, vector<2x128xf32> -> vector<2x128xf32>
    %17 = arith.addf %12, %16 : vector<2x128xf32>
    %c0_14 = arith.constant 0 : index
    %c0_15 = arith.constant 0 : index
    %18 = vector.load %arg9[%c0_14, %c0_15] : memref<2x128xf32, #tpu.memory_space<vmem>>, vector<2x128xf32>
    tpu.vector_store %arg9[%c0_14, %c0_15], %17 {strides = array<i32>} : memref<2x128xf32, #tpu.memory_space<vmem>>, vector<2x128xf32>,
    %c7_i32 = arith.constant 7 : i32
    %19 = arith.cmpi eq, %arg0, %c7_i32 : i32
    %20 = arith.extui %19 : i1 to i32
    %c0_i32_16 = arith.constant 0 : i32
    %21 = arith.cmpi ne, %20, %c0_i32_16 : i32
    scf.if %21 {
      %c0_17 = arith.constant 0 : index
      %c0_18 = arith.constant 0 : index
      %22 = vector.load %arg9[%c0_17, %c0_18] : memref<2x128xf32, #tpu.memory_space<vmem>>, vector<2x128xf32>
      %c0_19 = arith.constant 0 : index
      %c0_20 = arith.constant 0 : index
      %23 = vector.load %arg5[%c0_19, %c0_20] : memref<1x128xf32, #tpu.memory_space<vmem>>, vector<1x128xf32>
      %24 = vector.broadcast %23 : vector<1x128xf32> to vector<2x128xf32>
      %25 = arith.addf %22, %24 : vector<2x128xf32>
      %cst_21 = arith.constant 0.000000e+00 : f32
      %26 = vector.broadcast %cst_21 : f32 to vector<2x128xf32>
      %27 = arith.maximumf %25, %26 : vector<2x128xf32>
      %28 = arith.truncf %27 : vector<2x128xf32> to vector<2x128xbf16>
      %c0_22 = arith.constant 0 : index
      %c0_23 = arith.constant 0 : index
      %29 = vector.load %arg6[%c0_22, %c0_23] : memref<128x128xbf16, #tpu.memory_space<vmem>>, vector<128x128xbf16>
      %cst_24 = arith.constant dense<0.000000e+00> : vector<2x128xf32>
      %30 = tpu.matmul %28, %29, %cst_24 {dimension_numbers = #tpu.dot_dimension_numbers<[1], [0], [0], [1], [0, 0, 1, 1], [], []>} : vector<2x128xbf16>, vector<128x128xbf16>, vector<2x128xf32> -> vector<2x128xf32>
      %c0_25 = arith.constant 0 : index
      %c0_26 = arith.constant 0 : index
      %31 = vector.load %arg7[%c0_25, %c0_26] : memref<1x128xf32, #tpu.memory_space<vmem>>, vector<1x128xf32>
      %32 = vector.broadcast %31 : vector<1x128xf32> to vector<2x128xf32>
      %33 = arith.addf %30, %32 : vector<2x128xf32>
      %cst_27 = arith.constant 0.000000e+00 : f32
      %34 = vector.broadcast %cst_27 : f32 to vector<2x128xf32>
      %35 = arith.maximumf %33, %34 : vector<2x128xf32>
      %36 = tpu.iota {dimensions = array<i32: 1>} : vector<2x128xi32>
      %c56_i32 = arith.constant 56 : i32
      %37 = vector.broadcast %c56_i32 : i32 to vector<2x128xi32>
      %38 = arith.cmpi slt, %36, %37 : vector<2x128xi32>
      %cst_28 = arith.constant 0xFF800000 : f32
      %39 = vector.broadcast %cst_28 : f32 to vector<2x128xf32>
      %40 = arith.select %38, %35, %39 : vector<2x128xi1>, vector<2x128xf32>
      %cst_29 = arith.constant dense<0xFF800000> : vector<2xf32>
      %41 = vector.multi_reduction <maximumf>, %40, %cst_29 [1] : vector<2x128xf32> to vector<2xf32>
      %42 = vector.shape_cast %41 : vector<2xf32> to vector<2x1xf32>
      %43 = vector.broadcast %42 : vector<2x1xf32> to vector<2x128xf32>
      %44 = arith.subf %40, %43 : vector<2x128xf32>
      %45 = math.exp %44 : vector<2x128xf32>
      %cst_30 = arith.constant dense<0.000000e+00> : vector<2xf32>
      %46 = vector.multi_reduction <add>, %45, %cst_30 [1] : vector<2x128xf32> to vector<2xf32>
      %47 = vector.shape_cast %46 : vector<2xf32> to vector<2x1xf32>
      %48 = vector.broadcast %47 : vector<2x1xf32> to vector<2x128xf32>
      %49 = arith.divf %45, %48 : vector<2x128xf32>
      %c0_31 = arith.constant 0 : index
      %c0_32 = arith.constant 0 : index
      %50 = vector.load %arg8[%c0_31, %c0_32] : memref<2x128xf32, #tpu.memory_space<vmem>>, vector<2x128xf32>
      tpu.vector_store %arg8[%c0_31, %c0_32], %49 {strides = array<i32>} : memref<2x128xf32, #tpu.memory_space<vmem>>, vector<2x128xf32>,
    } else {
    }
    return
  }
  func.func @transform_0(%arg0: i32) -> (i32, i32, i32) {
    %c0_i32 = arith.constant 0 : i32
    %c0_i32_0 = arith.constant 0 : i32
    %c0_i32_1 = arith.constant 0 : i32
    return %arg0, %c0_i32, %c0_i32_0 : i32, i32, i32
  }
  func.func @transform_1(%arg0: i32) -> (i32, i32) {
    %c0_i32 = arith.constant 0 : i32
    %c0_i32_0 = arith.constant 0 : i32
    %c0_i32_1 = arith.constant 0 : i32
    return %c0_i32, %c0_i32_0 : i32, i32
  }
  func.func @transform_2(%arg0: i32) -> (i32, i32) {
    %c0_i32 = arith.constant 0 : i32
    %c0_i32_0 = arith.constant 0 : i32
    %c0_i32_1 = arith.constant 0 : i32
    return %c0_i32, %c0_i32_0 : i32, i32
  }
  func.func @transform_3(%arg0: i32) -> (i32, i32, i32) {
    %c0_i32 = arith.constant 0 : i32
    %c0_i32_0 = arith.constant 0 : i32
    %c0_i32_1 = arith.constant 0 : i32
    return %arg0, %c0_i32, %c0_i32_0 : i32, i32, i32
  }
  func.func @transform_4(%arg0: i32) -> (i32, i32) {
    %c0_i32 = arith.constant 0 : i32
    %c0_i32_0 = arith.constant 0 : i32
    %c0_i32_1 = arith.constant 0 : i32
    return %c0_i32, %c0_i32_0 : i32, i32
  }
  func.func @transform_5(%arg0: i32) -> (i32, i32) {
    %c0_i32 = arith.constant 0 : i32
    %c0_i32_0 = arith.constant 0 : i32
    %c0_i32_1 = arith.constant 0 : i32
    return %c0_i32, %c0_i32_0 : i32, i32
  }
  func.func @transform_6(%arg0: i32) -> (i32, i32) {
    %c0_i32 = arith.constant 0 : i32
    %c0_i32_0 = arith.constant 0 : i32
    %c0_i32_1 = arith.constant 0 : i32
    return %c0_i32, %c0_i32_0 : i32, i32
  }
  func.func @transform_7(%arg0: i32) -> (i32, i32) {
    %c0_i32 = arith.constant 0 : i32
    %c0_i32_0 = arith.constant 0 : i32
    %c0_i32_1 = arith.constant 0 : i32
    return %c0_i32, %c0_i32_0 : i32, i32
  }
}

</mosaic_0001>

<bundles_post_ra>
// kernel: net_forward.1
= control target key start
LH: loop header
LB: loop body
LE: loop exit
PB: predicated region body
PF: predicated region fallthrough
CT: control target
= control target key end

     0   :  { %12 = vsyncpa [#allocation4], 0  ;;  %s2453_s0 = inlined_call_operand.vmem [shape: bf16[8,2,288], index: 0, kind: input, shape index: {}]   ;;  %s2454_s1 = inlined_call_operand.vmem [shape: bf16[288,432], index: 1, kind: input, shape index: {}]   ;;  %s2455_s2 = inlined_call_operand.vmem [shape: f32[1,432], index: 2, kind: input, shape index: {}]   ;;  %s2456_s3 = inlined_call_operand.hbm [shape: bf16[8,432,128], index: 3, kind: input, shape index: {}]   ;;  %s2457_s4 = inlined_call_operand.vmem [shape: f32[1,128], index: 4, kind: input, shape index: {}]   ;;  %s2458_s5 = inlined_call_operand.vmem [shape: bf16[128,128], index: 5, kind: input, shape index: {}]   ;;  %s2459_s6 = inlined_call_operand.vmem [shape: f32[1,128], index: 6, kind: input, shape index: {}]   ;;  %s2460_s7 = inlined_call_operand.hbm [shape: f32[2,128], index: 7, kind: output, shape index: {}]  }
   0x1   :  { %14 = vsyncpa [#allocation4 + $0x1], 0 }
   0x2   :  { %15 = vsyncpa [#allocation5], 0  ;;  %s2015_s24 = smov 0   ;;  %s2017_s25 = smov 0  }
   0x3   :  { %s2019_s26 = smov 0   ;;  %s2021_s27 = smov 0  }
   0x4 LB: > { %s2034_s28 = sadd.s32 4294967295, %s1964_s27   ;;  %s2037_s29 = sadd.s32 1, %s1964_s27   ;;  %s1964_s27 = sphi %s2021_s27, %s2467_s27   ;;  %s1960_s26 = sphi %s2019_s26, %s2466_s26   ;;  %s1956_s25 = sphi %s2017_s25, %s2465_s25   ;;  %s1952_s24 = sphi %s2015_s24, %s2464_s24  }
   0x5   : > { %s93_s30 = ssub.s32 %s1964_s27, %s2037_s29  ;;  %s96_s8 = sadd.s32 1, %s1960_s26 }
   0x6   : > { %p94_p0 = scmp.eq.s32.totalorder %s93_s30, 0  ;;  %p103_p1 = scmp.ne.s32.totalorder %s1960_s26, %s1956_s25 }
   0x7   : > { %p104_p2 = scmp.eq.s32.totalorder %s1964_s27, 0  ;;  %p109_p3 = scmp.ne.s32.totalorder %s1956_s25, %s1952_s24 }
   0x8   : > { %s2047_s9 = scalar_select %p94_p0, %s1960_s26, %s96_s8  }
   0x9   : > { %p105_p4 = por %p104_p2, %p103_p1  ;;  %p110_p5 = scmp.eq.s32.totalorder %s2034_s28, 0 }
   0xa   : > { %p1680_p6 = scmp.lt.s32.totalorder %s1964_s27, 8  ;;  %s239_s11 = sand.u32 1, %s1960_s26  }
   0xb   : > { %p2051_p7 = por %p110_p5, %p109_p3  ;;  %s1666_s12 = smul.u32 216, %s239_s11 }
   0xc   : > { %s1667_s13 = smul.u32 3456, %s1964_s27  ;;  %p2057_p8 = pnand %p1680_p6, %p105_p4 }
   0xd   : > { %s243_s18 = scalar_lea.vmem [#allocation3], %s1666_s12  ;;  %s2069_s20 = scalar_lea.sflag [#allocation4], %s239_s11 }
   0xe   : > { %s2064_s17 = scalar_lea.hbm %s2456_s3, %s1667_s13  ;;  %s250_s19 = sshll.u32 %s243_s18, 4  ;;  %s2066_s19 = int_to_ptr.vmem [resolvable:$true] %s250_s19 }
   0xf   : > { %s1870_s21 = scalar_lea.hbm %s2064_s17, 3456  ;;  %p1872_p11 = pneg %p2057_p8 }
  0x10   : > { %p1871_p10 = scmp.ne.s32.totalorder %s2064_s17, %s1870_s21  ;;  %s1875_s24 = scalar_lea.hbm %s2456_s3, 27648 }
  0x11   : > { %p1876_p0 = scmp.lt.u32.totalorder %s2064_s17, %s2456_s3  ;;  %p1877_p1 = scmp.lt.u32.totalorder %s1875_s24, %s1870_s21 }
  0x12   : > { %p1873_p12 = pnand %p1872_p11, %p1871_p10  ;;  %p1879_p3 = scmp.lt.u32.totalorder %s1870_s21, %s2064_s17 }
  0x13   : > { %p1878_p2 = por %p1877_p1, %p1876_p0 }
  0x14   : > { %p1874_p13 = pneg %p1873_p12 }
  0x15   : > { %p1880_p4 = por %p1879_p3, %p1878_p2 }
  0x17   : > { %p1881_p5 = pnand %p1880_p4, %p1874_p13 }
  0x19   : > { %1884 = shalt.err (!%p1881_p5)
}
  0x1a   : > { %s1885_s11 = scalar_lea.vmem %s2066_s19, 3456  ;;  %s1966_s12 = smov [#allocation3]  }
  0x1b   : > { %p1886_p6 = scmp.ne.s32.totalorder %s2066_s19, %s1885_s11  ;;  %s1890_s13 = sshll.u32 %s1966_s12, 4  ;;  %s1891_s13 = int_to_ptr.vmem [resolvable:$false] %s1890_s13 }
  0x1c   : > { %s1892_s15 = scalar_lea.vmem %s1891_s13, 6912  ;;  %p1893_p9 = scmp.lt.s32.totalorder %s2066_s19, %s1891_s13 }
  0x1d   : > { %p1888_p10 = pnand %p1886_p6, %p1872_p11  ;;  %p1894_p0 = scmp.lt.s32.totalorder %s1892_s15, %s1885_s11 }
  0x1f   : > { %p1889_p12 = pneg %p1888_p10  ;;  %p1895_p1 = por %p1894_p0, %p1893_p9 }
  0x21   : > { %p1896_p2 = pnand %p1895_p1, %p1889_p12 }
  0x23   : > { %1899 = shalt.err (!%p1896_p2)
}
  0x24   : > { %s1967_s16 = smov 64   ;;  %s1968_s18 = smov 4  }
  0x25   : > { %1679 = dma.hbm_to_vmem [thread:$0]  (!%p2057_p8), %s2064_s17, 3456, %s2066_s19, %s2069_s20, %s1967_s16, %s1967_s16, %s1968_s18  }
  0x26   : > { %p258_p11 = scmp.lt.s32.totalorder %s1964_s27, 9  ;;  %p2463_p13 = scmp.ge.s32.totalorder %s1964_s27, 1 }
  0x28   : > { %p259_p3 = pnand %p2463_p13, %p258_p11 }
  0x29   : > { %s264_s21 = sand.u32 (!%p259_p3), 1, %s1956_s25  }
  0x2a   : > { %262 = sbr.rel (%p259_p3) target bundleno = 1152 (0x480), region = 48  ;;  %s265_s23 = scalar_lea.sflag (!%p259_p3), [#allocation4], %s264_s21 }
  0x2b   : > { %s1668_s22 = smul.u32 (!%p259_p3), 216, %s264_s21 }
  0x2d   : > { %s2101_s24 = scalar_lea.vmem (!%p259_p3), [#allocation3], %s1668_s22 }
  0x31   : > { %1943 = dma.done.wait (%p2051_p7), %s265_s23, 3456  }
  0x32   : > { %1945 = vsyncadd (%p2051_p7), %s265_s23, 4294963840  ;;  %p298_p9 = scmp.lt.s32.totalorder %s2034_s28, 7  ;;  %p1486_p8 = scmp.ne.s32.totalorder %s2034_s28, 0 }
  0x33   : > { %v1969_v0 = vmov (!%p1486_p8), 0.0  }
  0x34   : > { %s299_s14 = scalar_select %p298_p9, %s2034_s28, 7 }
  0x35   : > { %306 = sbr.rel (%p1486_p8) target bundleno = 60 (0x3c), region = 56  ;;  %307 = vst [vmem:[#allocation2] sm:$0x3] (!%p1486_p8), %v1969_v0 }
  0x36   : > { %s1669_s17 = smul.u32 3, %s299_s14 }
  0x38   : > { %s2112_s20 = scalar_lea.vmem %s2453_s0, %s1669_s17 }
  0x3c PF: > { %v1723_v1 = vld [vmem:[%s2454_s1 + $0x4] ss:$16 sps:$4 sm:$0xff]   ;;  %v1725_v2 = vld [vmem:[%s2454_s1] ss:$16 sps:$4 sm:$0xff]   ;;  %v1737_v7 = vld [vmem:[%s2454_s1 + $0xc] ss:$16 sps:$4 sm:$0xff]   ;;  %v383_v31 = vlaneseq }
  0x3d   : > { %793 = vmatprep.subr.bf16.mxu0 %v1723_v1  ;;  %v1726_v3 = vld [vmem:[%s2454_s1 + $0x24] ss:$16 sps:$4 sm:$0xff]   ;;  %v1728_v4 = vld [vmem:[%s2454_s1 + $0x20] ss:$16 sps:$4 sm:$0xff]   ;;  %v1740_v8 = vld [vmem:[%s2454_s1 + $0x8] ss:$16 sps:$4 sm:$0xff]   ;;  %875 = vmatprep.subr.bf16.mxu1 %v1737_v7 }
  0x3e   : > { %794 = vmatpush1.bf16.msra.mxu0 %v1725_v2  ;;  %v1729_v5 = vld [vmem:[%s2454_s1 + $0x44] ss:$16 sps:$4 sm:$0xff]   ;;  %v1731_v6 = vld [vmem:[%s2454_s1 + $0x40] ss:$16 sps:$4 sm:$0xff]   ;;  %v1743_v10 = vld [vmem:[%s2454_s1 + $0x2c] ss:$16 sps:$4 sm:$0xff]   ;;  %876 = vmatpush1.bf16.msra.mxu1 %v1740_v8 }
  0x3f   : > { %795 = vmatprep.subr.bf16.mxu0 %v1726_v3  ;;  %v1732_v9 = vld [vmem:[%s2454_s1 + $0x64] ss:$16 sps:$4 sm:$0xff]   ;;  %v1746_v11 = vld [vmem:[%s2454_s1 + $0x28] ss:$16 sps:$4 sm:$0xff]   ;;  %v1734_v12 = vld [vmem:[%s2454_s1 + $0x60] ss:$16 sps:$4 sm:$0xff]   ;;  %877 = vmatprep.subr.bf16.mxu1 %v1743_v10 }
  0x40   : > { %v1735_v13 = vld [vmem:[%s2454_s1 + $0x84] ss:$16 sps:$4 sm:$0xff]   ;;  %v1749_v14 = vld [vmem:[%s2454_s1 + $0x4c] ss:$16 sps:$4 sm:$0xff]   ;;  %v1752_v15 = vld [vmem:[%s2454_s1 + $0x48] ss:$16 sps:$4 sm:$0xff]  }
  0x41   : > { %v1739_v16 = vld [vmem:[%s2454_s1 + $0x80] ss:$16 sps:$4 sm:$0xff]   ;;  %v1755_v17 = vld [vmem:[%s2454_s1 + $0x6c] ss:$16 sps:$4 sm:$0xff]   ;;  %v1741_v18 = vld [vmem:[%s2454_s1 + $0xa4] ss:$16 sps:$4 sm:$0xff]  }
  0x42   : > { %796 = vmatpush1.bf16.msra.mxu0 %v1728_v4  ;;  %878 = vmatpush1.bf16.msra.mxu1 %v1746_v11  ;;  %v1745_v19 = vld [vmem:[%s2454_s1 + $0xa0] ss:$16 sps:$4 sm:$0xff]   ;;  %v1758_v20 = vld [vmem:[%s2454_s1 + $0x68] ss:$16 sps:$4 sm:$0xff]   ;;  %v1761_v21 = vld [vmem:[%s2454_s1 + $0x8c] ss:$16 sps:$4 sm:$0xff]  }
  0x43   : > { %797 = vmatprep.subr.bf16.mxu0 %v1729_v5  ;;  %879 = vmatprep.subr.bf16.mxu1 %v1749_v14  ;;  %v1747_v22 = vld [vmem:[%s2454_s1 + $0xc4] ss:$16 sps:$4 sm:$0xff]   ;;  %v1764_v23 = vld [vmem:[%s2454_s1 + $0x88] ss:$16 sps:$4 sm:$0xff]   ;;  %v1751_v24 = vld [vmem:[%s2454_s1 + $0xc0] ss:$16 sps:$4 sm:$0xff]  }
  0x44   : > { %v1767_v25 = vld [vmem:[%s2454_s1 + $0xac] ss:$16 sps:$4 sm:$0xff]   ;;  %v1753_v26 = vld [vmem:[%s2454_s1 + $0xe4] ss:$16 sps:$4 sm:$0xff]   ;;  %v1757_v27 = vld [vmem:[%s2454_s1 + $0xe0] ss:$16 sps:$4 sm:$0xff]  }
  0x45   : > { %v1770_v28 = vld [vmem:[%s2454_s1 + $0xa8] ss:$16 sps:$4 sm:$0xff]   ;;  %v1773_v29 = vld [vmem:[%s2454_s1 + $0xcc] ss:$16 sps:$4 sm:$0xff]   ;;  %v1759_v30 = vld [vmem:[%s2454_s1 + $0x104] ss:$16 sps:$4 sm:$0xff]  }
  0x46   : > { %798 = vmatpush1.bf16.msra.mxu0 %v1731_v6  ;;  %880 = vmatpush1.bf16.msra.mxu1 %v1752_v15  ;;  %v1970_v32 = vmov 1966171168   ;;  %v1776_v34 = vld [vmem:[%s2454_s1 + $0xc8] ss:$16 sps:$4 sm:$0xff]   ;;  %v1763_v35 = vld [vmem:[%s2454_s1 + $0x100] ss:$16 sps:$4 sm:$0xff]  }
  0x47   : > { %799 = vmatprep.subr.bf16.mxu0 %v1732_v9  ;;  %881 = vmatprep.subr.bf16.mxu1 %v1755_v17  ;;  %v413_v33 = vunpack.c.l.s4 %v1970_v32  ;;  %v1779_v36 = vld [vmem:[%s2454_s1 + $0xec] ss:$16 sps:$4 sm:$0xff]   ;;  %v1765_v37 = vld [vmem:[%s2454_s1 + $0x124] ss:$16 sps:$4 sm:$0xff]   ;;  %v2218_v38 = vshrl.u32 %v383_v31, 7  ;;  %v1971_v15 = vmov 0  }
  0x48   : > { %v1769_v40 = vld [vmem:[%s2454_s1 + $0x120] ss:$16 sps:$4 sm:$0xff]   ;;  %v1782_v41 = vld [vmem:[%s2454_s1 + $0xe8] ss:$16 sps:$4 sm:$0xff]   ;;  %v1785_v42 = vld [vmem:[%s2454_s1 + $0x10c] ss:$16 sps:$4 sm:$0xff]  }
  0x49   : > { %v414_v39 = vunpack.c.0.s8 %v413_v33  ;;  %v1771_v43 = vld [vmem:[%s2454_s1 + $0x144] ss:$16 sps:$4 sm:$0xff]   ;;  %v1775_v45 = vld [vmem:[%s2454_s1 + $0x140] ss:$16 sps:$4 sm:$0xff]   ;;  %v1788_v47 = vld [vmem:[%s2454_s1 + $0x108] ss:$16 sps:$4 sm:$0xff]  }
  0x4a   : > { %800 = vmatpush1.bf16.msra.mxu0 %v1734_v12  ;;  %882 = vmatpush1.bf16.msra.mxu1 %v1758_v20  ;;  %v1487_v46 = vld.sshfl [vmem:[%s2112_s20] sm:$0x13 pattern:$0x75316420]  ;;  %v1791_v49 = vld [vmem:[%s2454_s1 + $0x12c] ss:$16 sps:$4 sm:$0xff]  }
  0x4b   : > { %801 = vmatprep.subr.bf16.mxu0 %v1735_v13  ;;  %883 = vmatprep.subr.bf16.mxu1 %v1761_v21  ;;  %v417_v44 = vsub.s32 %v414_v39, %v2218_v38  ;;  %v411_v48 = vcombine.high %v1487_v46, %v1487_v46  ;;  %v1777_v50 = vld [vmem:[%s2454_s1 + $0x164] ss:$16 sps:$4 sm:$0xff]   ;;  %v1781_v52 = vld [vmem:[%s2454_s1 + $0x160] ss:$16 sps:$4 sm:$0xff]   ;;  %v1794_v53 = vld [vmem:[%s2454_s1 + $0x128] ss:$16 sps:$4 sm:$0xff]  }
  0x4c   : > { %v1797_v54 = vld [vmem:[%s2454_s1 + $0x14c] ss:$16 sps:$4 sm:$0xff]   ;;  %v1783_v55 = vld [vmem:[%s2454_s1 + $0x184] ss:$16 sps:$4 sm:$0xff]   ;;  %v1787_v56 = vld [vmem:[%s2454_s1 + $0x180] ss:$16 sps:$4 sm:$0xff]  }
  0x4d   : > { %v425_v51 = vrot.slane %v411_v48, %v417_v44  ;;  %v1800_v57 = vld [vmem:[%s2454_s1 + $0x148] ss:$16 sps:$4 sm:$0xff]   ;;  %v1803_v58 = vld [vmem:[%s2454_s1 + $0x16c] ss:$16 sps:$4 sm:$0xff]   ;;  %v1789_v59 = vld [vmem:[%s2454_s1 + $0x1a4] ss:$16 sps:$4 sm:$0xff]   ;;  %v418_v9 = vrot.slane %v1487_v46, %v417_v44 }
  0x4e   : > { %802 = vmatpush1.bf16.msra.mxu0 %v1739_v16  ;;  %884 = vmatpush1.bf16.msra.mxu1 %v1764_v23  ;;  %v1793_v60 = vld [vmem:[%s2454_s1 + $0x1a0] ss:$16 sps:$4 sm:$0xff]   ;;  %v1806_v61 = vld [vmem:[%s2454_s1 + $0x168] ss:$16 sps:$4 sm:$0xff]   ;;  %v1810_v62 = vld [vmem:[%s2454_s1 + $0x18c] ss:$16 sps:$4 sm:$0xff]  }
  0x4f   : > { %803 = vmatprep.subr.bf16.mxu0 %v1741_v18  ;;  %885 = vmatprep.subr.bf16.mxu1 %v1767_v25  ;;  %v1795_v63 = vld [vmem:[%s2454_s1 + $0x1c4] ss:$16 sps:$4 sm:$0xff]   ;;  %v1799_v0 = vld [vmem:[%s2454_s1 + $0x1c0] ss:$16 sps:$4 sm:$0xff]   ;;  %v1812_v1 = vld [vmem:[%s2454_s1 + $0x188] ss:$16 sps:$4 sm:$0xff]   ;;  %v426_v18 = vcombine.high %v418_v9, %v418_v9 }
  0x50   : > { %825 = vmatprep.mubr.bf16.mxu0 %v425_v51  ;;  %907 = vmatprep.mubr.bf16.mxu1 %v425_v51  ;;  %v1813_v2 = vld [vmem:[%s2454_s1 + $0x1ac] ss:$16 sps:$4 sm:$0xff]   ;;  %v1801_v3 = vld [vmem:[%s2454_s1 + $0x1e4] ss:$16 sps:$4 sm:$0xff]   ;;  %v1805_v4 = vld [vmem:[%s2454_s1 + $0x1e0] ss:$16 sps:$4 sm:$0xff]  }
  0x51   : > { %v1815_v5 = vld [vmem:[%s2454_s1 + $0x1a8] ss:$16 sps:$4 sm:$0xff]   ;;  %v1819_v6 = vld [vmem:[%s2454_s1 + $0x1cc] ss:$16 sps:$4 sm:$0xff]   ;;  %v1809_v7 = vld [vmem:[%s2454_s1 + $0x204] ss:$16 sps:$4 sm:$0xff]  }
  0x52   : > { %804 = vmatpush1.bf16.msra.mxu0 %v1745_v19  ;;  %886 = vmatpush1.bf16.msra.mxu1 %v1770_v28  ;;  %v1807_v8 = vld [vmem:[%s2454_s1 + $0x200] ss:$16 sps:$4 sm:$0xff]   ;;  %v1821_v10 = vld [vmem:[%s2454_s1 + $0x1c8] ss:$16 sps:$4 sm:$0xff]   ;;  %v1818_v11 = vld [vmem:[%s2454_s1 + $0x224] ss:$16 sps:$4 sm:$0xff]  }
  0x53   : > { %805 = vmatprep.subr.bf16.mxu0 %v1747_v22  ;;  %887 = vmatprep.subr.bf16.mxu1 %v1773_v29  ;;  %v1822_v12 = vld [vmem:[%s2454_s1 + $0x1ec] ss:$16 sps:$4 sm:$0xff]   ;;  %v1827_v13 = vld [vmem:[%s2454_s1 + $0x1e8] ss:$16 sps:$4 sm:$0xff]   ;;  %v1816_v14 = vld [vmem:[%s2454_s1 + $0x220] ss:$16 sps:$4 sm:$0xff]  }
  0x54   : > { %v1826_v16 = vld [vmem:[%s2454_s1 + $0x20c] ss:$16 sps:$4 sm:$0xff]   ;;  %vm789_vm0 = vcmask 261120   ;;  %v1824_v20 = vld [vmem:[%s2454_s1 + $0x208] ss:$16 sps:$4 sm:$0xff]   ;;  %vm1182_vm1 = vcmask 392192  }
  0x55   : > { %v1831_v17 = vld [vmem:[%s2101_s24 + $0x80] sm:$0xff]   ;;  %v1834_v19 = vld [vmem:[%s2101_s24 + $0x88] sm:$0xff]   ;;  %v1837_v22 = vld [vmem:[%s2101_s24 + $0x90] sm:$0xff]   ;;  %p1590_p7 = scmp.ne.s32.totalorder %s2034_s28, 7 }
  0x56   : > { %806 = vmatpush1.bf16.msra.mxu0 %v1751_v24  ;;  %888 = vmatpush1.bf16.msra.mxu1 %v1776_v34  ;;  %v1830_v21 = vld [vmem:[%s2454_s1 + $0x22c] ss:$16 sps:$4 sm:$0xff]   ;;  %v1828_v23 = vld [vmem:[%s2454_s1 + $0x228] ss:$16 sps:$4 sm:$0xff]   ;;  %v381_v51 = vld [vmem:[%s2455_s2] sm:$0xf] }
  0x57   : > { %807 = vmatprep.subr.bf16.mxu0 %v1753_v26  ;;  %889 = vmatprep.subr.bf16.mxu1 %v1779_v36  ;;  %v1832_v24 = vld [vmem:[%s2101_s24 + $0x40] sm:$0xff]   ;;  %v1840_v25 = vld [vmem:[%s2101_s24 + $0x98] sm:$0xff]   ;;  %v1836_v29 = vld [vmem:[%s2101_s24 + $0x8] sm:$0xff]   ;;  %vm1973_vm2 = vmmov (!%p1590_p7), 0   ;;  %vm1399_vm4 = vcmask (!%p1590_p7), 1041408  }
  0x58   : > { %v1833_v26 = vld [vmem:[%s2101_s24] sm:$0xff]   ;;  %v1846_v32 = vld [vmem:[%s2101_s24 + $0xa8] sm:$0xff]   ;;  %v1839_v33 = vld [vmem:[%s2101_s24 + $0x10] sm:$0xff]  }
  0x59   : > { %v1843_v28 = vld [vmem:[%s2101_s24 + $0xa0] sm:$0xff]   ;;  %v1841_v34 = vld [vmem:[%s2101_s24 + $0x58] sm:$0xff]   ;;  %v1856_v48 = vld [vmem:[%s2101_s24 + $0xc8] sm:$0xff]  }
  0x5a   : > { %808 = vmatpush1.bf16.msra.mxu0 %v1757_v27  ;;  %890 = vmatpush1.bf16.msra.mxu1 %v1782_v41  ;;  %v1835_v27 = vld [vmem:[%s2101_s24 + $0x48] sm:$0xff]   ;;  %v1842_v36 = vld [vmem:[%s2101_s24 + $0x18] sm:$0xff]   ;;  %v1845_v39 = vld [vmem:[%s2101_s24 + $0x20] sm:$0xff]  }
  0x5b   : > { %809 = vmatprep.subr.bf16.mxu0 %v1759_v30  ;;  %891 = vmatprep.subr.bf16.mxu1 %v1785_v42  ;;  %v1838_v30 = vld [vmem:[%s2101_s24 + $0x50] sm:$0xff]   ;;  %v1848_v41 = vld [vmem:[%s2101_s24 + $0x28] sm:$0xff]   ;;  %v1852_v44 = vld [vmem:[%s2101_s24 + $0xb8] sm:$0xff]  }
  0x5c   : > { %v1850_v42 = vld [vmem:[%s2101_s24 + $0x70] sm:$0xff]   ;;  %v1854_v46 = vld [vmem:[%s2101_s24 + $0x38] sm:$0xff]  }
  0x5e   : > { %810 = vmatpush1.bf16.msra.mxu0 %v1763_v35  ;;  %892 = vmatpush1.bf16.msra.mxu1 %v1788_v47  ;;  %v1849_v35 = vld [vmem:[%s2101_s24 + $0xb0] sm:$0xff]   ;;  %v1855_v47 = vld [vmem:[%s2101_s24 + $0xc0] sm:$0xff]  }
  0x5f   : > { %811 = vmatprep.subr.bf16.mxu0 %v1765_v37  ;;  %893 = vmatprep.subr.bf16.mxu1 %v1791_v49  ;;  %v1844_v37 = vld [vmem:[%s2101_s24 + $0x60] sm:$0xff]   ;;  %v1857_v49 = vld [vmem:[%s2101_s24 + $0xd0] sm:$0xff]  }
  0x62   : > { %812 = vmatpush1.bf16.msra.mxu0 %v1769_v40  ;;  %894 = vmatpush1.bf16.msra.mxu1 %v1794_v53  ;;  %v1847_v40 = vld [vmem:[%s2101_s24 + $0x68] sm:$0xff]  }
  0x63   : > { %813 = vmatprep.subr.bf16.mxu0 %v1771_v43  ;;  %895 = vmatprep.subr.bf16.mxu1 %v1797_v54  ;;  %v1851_v43 = vld [vmem:[%s2101_s24 + $0x30] sm:$0xff]  }
  0x66   : > { %814 = vmatpush1.bf16.msra.mxu0 %v1775_v45  ;;  %896 = vmatpush1.bf16.msra.mxu1 %v1800_v57  ;;  %v1853_v45 = vld [vmem:[%s2101_s24 + $0x78] sm:$0xff]  }
  0x67   : > { %815 = vmatprep.subr.bf16.mxu0 %v1777_v50  ;;  %897 = vmatprep.subr.bf16.mxu1 %v1803_v58  ;;  %v385_v50 = vsub.s32 0, %v2218_v38 }
  0x6a   : > { %816 = vmatpush1.bf16.msra.mxu0 %v1781_v52  ;;  %898 = vmatpush1.bf16.msra.mxu1 %v1806_v61  ;;  %v389_v52 = vsub.s32 1, %v2218_v38 }
  0x6b   : > { %817 = vmatprep.subr.bf16.mxu0 %v1783_v55  ;;  %899 = vmatprep.subr.bf16.mxu1 %v1810_v62  ;;  %v386_v55 = vrot.slane %v381_v51, %v385_v50 }
  0x6c   : > { %v390_v58 = vrot.slane %v381_v51, %v389_v52 }
  0x6e   : > { %818 = vmatpush1.bf16.msra.mxu0 %v1787_v56  ;;  %900 = vmatpush1.bf16.msra.mxu1 %v1812_v1  ;;  %v393_v56 = vsub.s32 2, %v2218_v38 }
  0x6f   : > { %819 = vmatprep.subr.bf16.mxu0 %v1789_v59  ;;  %901 = vmatprep.subr.bf16.mxu1 %v1813_v2  ;;  %v397_v59 = vsub.s32 3, %v2218_v38 }
  0x72   : > { %820 = vmatpush1.bf16.msra.mxu0 %v1793_v60  ;;  %902 = vmatpush1.bf16.msra.mxu1 %v1815_v5 }
  0x73   : > { %821 = vmatprep.subr.bf16.mxu0 %v1795_v63  ;;  %903 = vmatprep.subr.bf16.mxu1 %v1819_v6 }
  0x76   : > { %822 = vmatpush1.bf16.msra.mxu0 %v1799_v0  ;;  %904 = vmatpush1.bf16.msra.mxu1 %v1821_v10  ;;  %v394_v0 = vrot.slane %v381_v51, %v393_v56 }
  0x77   : > { %823 = vmatprep.subr.bf16.mxu0 %v1801_v3  ;;  %905 = vmatprep.subr.bf16.mxu1 %v1822_v12  ;;  %v398_v3 = vrot.slane %v381_v51, %v397_v59 }
  0x7a   : > { %824 = vmatpush1.bf16.msra.mxu0 %v1805_v4  ;;  %906 = vmatpush1.bf16.msra.mxu1 %v1827_v13 }
  0x7b   : > { %834 = vmatprep.subr.bf16.mxu0 %v1809_v7  ;;  %1226 = vmatprep.subr.bf16.mxu1 %v1971_v15 }
  0x7d   : > { %826 = vmatmul.mubr.bf16.vlgmr.msra.gmra.mrb[0].mxu0 %v418_v9  ;;  %908 = vmatmul.mubr.bf16.vlgmr.msra.gmra.mrb[0].mxu1 %v418_v9 }
  0x7e   : > { %835 = vmatpush1.bf16.msra.mxu0 %v1807_v8  ;;  %866 = vmatprep.mubr.bf16.mxu0 %v1971_v15 }
  0x7f   : > { %836 = vmatprep.subr.bf16.mxu0 %v1818_v11  ;;  %1227 = vmatpush1.bf16.msra.mxu1 %v1831_v17 }
  0x80   : > { %1228 = vmatprep.subr.bf16.mxu1 %v1971_v15 }
  0x82   : > { %837 = vmatpush1.bf16.msra.mxu0 %v1816_v14 }
  0x83   : > { %916 = vmatprep.subr.bf16.mxu0 %v1826_v16  ;;  %1229 = vmatpush1.bf16.msra.mxu1 %v1834_v19 }
  0x84   : > { %1230 = vmatprep.subr.bf16.mxu1 %v1971_v15 }
  0x87   : > { %1231 = vmatpush1.bf16.msra.mxu1 %v1837_v22 }
  0x88   : > { %1232 = vmatprep.subr.bf16.mxu1 %v1971_v15 }
  0x89   : > { %1560 = vmatmul.mubr.msk.bf16.vlgmr.msra.gmra.mrb[0].mxu0 %vm789_vm0, %v426_v18 }
  0x8a   : > { %917 = vmatpush1.bf16.msra.mxu0 %v1824_v20  ;;  %948 = vmatprep.mubr.bf16.mxu0 %v1971_v15 }
  0x8b   : > { %918 = vmatprep.subr.bf16.mxu0 %v1830_v21  ;;  %1233 = vmatpush1.bf16.msra.mxu1 %v1840_v25  ;;  %v961_v25 = vld [vmem:[#allocation2] sm:$0x3] }
  0x8c   : > { %1234 = vmatprep.subr.bf16.mxu1 %v1971_v15 }
  0x8e   : > { %919 = vmatpush1.bf16.msra.mxu0 %v1828_v23 }
  0x8f   : > { %1605 = vmatprep.subr.bf16.mxu0 %v1832_v24  ;;  %1235 = vmatpush1.bf16.msra.mxu1 %v1843_v28 }
  0x90   : > { %1236 = vmatprep.subr.bf16.mxu1 %v1971_v15 }
  0x91   : > { %1561 = vmatmul.mubr.msk.bf16.vlgmr.msra.gmra.mrb[4].mxu0 %vm789_vm0, %v426_v18 }
  0x92   : > { %1606 = vmatpush3.bf16.msra.mxu0 %v1833_v26 }
  0x93   : > { %1607 = vmatprep.subr.bf16.mxu0 %v1835_v27  ;;  %1237 = vmatpush1.bf16.msra.mxu1 %v1846_v32 }
  0x94   : > { %1238 = vmatprep.subr.bf16.mxu1 %v1971_v15 }
  0x96   : > { %1608 = vmatpush3.bf16.msra.mxu0 %v1836_v29 }
  0x97   : > { %1609 = vmatprep.subr.bf16.mxu0 %v1838_v30  ;;  %1239 = vmatpush1.bf16.msra.mxu1 %v1849_v35  ;;  %v1859_v35 = vld [vmem:[%s2458_s5 + $0x8] sm:$0xff] (!%p1590_p7)  }
  0x98   : > { %1240 = vmatprep.subr.bf16.mxu1 %v1971_v15 }
  0x9a   : > { %1610 = vmatpush3.bf16.msra.mxu0 %v1839_v33  ;;  %v1858_v33 = vld [vmem:[%s2458_s5] sm:$0xff] (!%p1590_p7)  }
  0x9b   : > { %1611 = vmatprep.subr.bf16.mxu0 %v1841_v34  ;;  %1241 = vmatpush1.bf16.msra.mxu1 %v1852_v44  ;;  %v1972_v34 = vmov (!%p1590_p7), 0.0   ;;  %v1864_v44 = vld [vmem:[%s2458_s5 + $0x30] sm:$0xff] (!%p1590_p7)  }
  0x9c   : > { %1242 = vmatprep.subr.bf16.mxu1 %v1971_v15 }
  0x9e   : > { %1612 = vmatpush3.bf16.msra.mxu0 %v1842_v36  ;;  %v1860_v36 = vld [vmem:[%s2458_s5 + $0x10] sm:$0xff] (!%p1590_p7)  }
  0x9f   : > { %1613 = vmatprep.subr.bf16.mxu0 %v1844_v37  ;;  %1243 = vmatpush1.bf16.msra.mxu1 %v1855_v47  ;;  %v1861_v37 = vld [vmem:[%s2458_s5 + $0x18] sm:$0xff] (!%p1590_p7)  }
  0xa0   : > { %1244 = vmatprep.subr.bf16.mxu1 %v1971_v15 }
  0xa2   : > { %1614 = vmatpush3.bf16.msra.mxu0 %v1845_v39  ;;  %v1862_v39 = vld [vmem:[%s2458_s5 + $0x20] sm:$0xff] (!%p1590_p7)  }
  0xa3   : > { %1615 = vmatprep.subr.bf16.mxu0 %v1847_v40  ;;  %1245 = vmatpush1.bf16.msra.mxu1 %v1856_v48  ;;  %v1863_v40 = vld [vmem:[%s2458_s5 + $0x28] sm:$0xff] (!%p1590_p7)   ;;  %v1592_v48 = vld [vmem:[%s2459_s6] ss:$0 sm:$0xff] (!%p1590_p7) }
  0xa4   : > { %1246 = vmatprep.subr.bf16.mxu1 %v1971_v15 }
  0xa6   : > { %1616 = vmatpush3.bf16.msra.mxu0 %v1848_v41 }
  0xa7   : > { %1617 = vmatprep.subr.bf16.mxu0 %v1850_v42  ;;  %1247 = vmatpush1.bf16.msra.mxu1 %v1857_v49  ;;  %v1591_v42 = vld [vmem:[%s2457_s4] ss:$0 sm:$0xff] (!%p1590_p7)  ;;  %v1396_v49 = vand.u32 (!%p1590_p7), 127, %v383_v31 }
  0xa9   : > { %vm1397_vm3 = vcmp.lt.s32.totalorder (!%p1590_p7), %v1396_v49, 56 }
  0xaa   : > { %1618 = vmatpush3.bf16.msra.mxu0 %v1851_v43 }
  0xab   : > { %1619 = vmatprep.subr.bf16.mxu0 %v1853_v45 }
  0xae   : > { %1620 = vmatpush3.bf16.msra.mxu0 %v1854_v46  ;;  %v1865_v46 = vld [vmem:[%s2458_s5 + $0x38] sm:$0xff] (!%p1590_p7)  }
  0xaf   : > { %1636 = vmatprep.subr.bf16.mxu0 (!%p1590_p7), %v1972_v34 }
 0x150   : > { %v909_v53 = vpop.f32.mrb[0].mxu1 }
 0x151   : > { %v911_v54 = vpop.f32.mrb[1].mxu1  ;;  %v910_v7 = vadd.f32 %v909_v53, %v394_v0 }
 0x152   : > { %v913_v57 = vpop.f32.mrb[2].mxu1  ;;  %v912_v9 = vadd.f32 %v911_v54, %v398_v3 }
 0x153   : > { %v914_v60 = vpop.f32.mrb[3].mxu1 }
 0x15c   : > { %v868_v61 = vpop.f32.mrb[0].mxu0 }
 0x15d   : > { %v1656_v62 = vadd.f32 %v868_v61, %v386_v55  ;;  %v870_v63 = vpop.f32.mrb[1].mxu0 }
 0x15e   : > { %v1657_v1 = vadd.f32 %v870_v63, %v390_v58  ;;  %v872_v2 = vpop.f32.mrb[2].mxu0 }
 0x15f   : > { %v957_v4 = vmax.f32 %v1656_v62, 0.0  ;;  %v873_v5 = vpop.f32.mrb[3].mxu0 }
 0x160   : > { %v958_v6 = vmax.f32 %v1657_v1, 0.0 }
 0x161   : > { %v962_v10 = vpack.c.bf16 %v957_v4, %v957_v4 }
 0x162   : > { %v963_v8 = vpack.c.bf16 %v958_v6, %v958_v6 }
 0x164   : > { %v950_v11 = vpop.f32.mrb[4].mxu0  ;;  %1218 = vmatprep.mubr.bf16.mxu0 %v963_v8 }
 0x165   : > { %v951_v12 = vadd.f32 %v950_v11, %v910_v7  ;;  %v952_v13 = vpop.f32.mrb[5].mxu0  ;;  %1219 = vmatmul.mubr.bf16.vlgmr.msra.gmra.mrb[8].mxu0 %v962_v10 }
 0x166   : > { %v953_v38 = vadd.f32 %v952_v13, %v912_v9  ;;  %v954_v14 = vpop.f32.mrb[6].mxu0  ;;  %1637 = vmatpush3.bf16.msra.mxu0 (!%p1590_p7), %v1858_v33  ;;  %1652 = vmatprep.mubr.msk.bf16.mxu0 (!%p1590_p7), %vm1973_vm2, %v1972_v34 }
 0x167   : > { %v959_v15 = vmax.f32 %v951_v12, 0.0  ;;  %v955_v16 = vpop.f32.mrb[7].mxu0  ;;  %1638 = vmatprep.subr.bf16.mxu0 (!%p1590_p7), %v1972_v34 }
 0x168   : > { %v960_v17 = vmax.f32 %v953_v38, 0.0 }
 0x169   : > { %v964_v19 = vpack.c.bf16 %v959_v15, %v959_v15 }
 0x16a   : > { %v965_v18 = vpack.c.bf16 %v960_v17, %v960_v17  ;;  %1639 = vmatpush3.bf16.msra.mxu0 (!%p1590_p7), %v1859_v35 }
 0x16b   : > { %1640 = vmatprep.subr.bf16.mxu0 (!%p1590_p7), %v1972_v34 }
 0x16c   : > { %1589 = vmatprep.mubr.msk.bf16.mxu1 %vm1182_vm1, %v965_v18 }
 0x16d   : > { %1259 = vmatmul.mubr.bf16.vlgmr.msra.gmra.mrb[4].mxu1 %v964_v19 }
 0x16e   : > { %1641 = vmatpush3.bf16.msra.mxu0 (!%p1590_p7), %v1860_v36 }
 0x16f   : > { %1642 = vmatprep.subr.bf16.mxu0 (!%p1590_p7), %v1972_v34 }
 0x172   : > { %1643 = vmatpush3.bf16.msra.mxu0 (!%p1590_p7), %v1861_v37 }
 0x173   : > { %1644 = vmatprep.subr.bf16.mxu0 (!%p1590_p7), %v1972_v34 }
 0x176   : > { %1645 = vmatpush3.bf16.msra.mxu0 (!%p1590_p7), %v1862_v39 }
 0x177   : > { %1646 = vmatprep.subr.bf16.mxu0 (!%p1590_p7), %v1972_v34 }
 0x17a   : > { %1647 = vmatpush3.bf16.msra.mxu0 (!%p1590_p7), %v1863_v40 }
 0x17b   : > { %1648 = vmatprep.subr.bf16.mxu0 (!%p1590_p7), %v1972_v34 }
 0x17e   : > { %1649 = vmatpush3.bf16.msra.mxu0 (!%p1590_p7), %v1864_v44 }
 0x17f   : > { %1650 = vmatprep.subr.bf16.mxu0 (!%p1590_p7), %v1972_v34 }
 0x182   : > { %1651 = vmatpush3.bf16.msra.mxu0 (!%p1590_p7), %v1865_v46 }
 0x238   : > { %v1621_v20 = vpop.f32.mrb[8].mxu0 }
 0x239   : > { %v1622_v21 = vpop.f32.mrb[9].mxu0 }
 0x23a   : > { %v1623_v22 = vadd.f32 %v1622_v21, %v1621_v20  ;;  %v1624_v23 = vpop.f32.mrb[10].mxu0 }
 0x23b   : > { %v1625_v24 = vpop.f32.mrb[11].mxu0 }
 0x23f   : > { %1271 = sbr.rel (%p1590_p7) target bundleno = 1127 (0x467), region = 60 }
 0x240   : > { %v1260_v26 = vpop.f32.mrb[4].mxu1 }
 0x241   : > { %v1261_v27 = vadd.f32 %v1623_v22, %v1260_v26  ;;  %v1262_v28 = vpop.f32.mrb[5].mxu1 }
 0x242   : > { %v1263_v29 = vpop.f32.mrb[6].mxu1 }
 0x243   : > { %v1266_v30 = vadd.f32 %v1261_v27, %v961_v25  ;;  %v1264_v32 = vpop.f32.mrb[7].mxu1 }
 0x245   : > { %1267 = vst [vmem:[#allocation2] sm:$0x3] %v1266_v30 }
 0x24c   : > { %v1272_v41 = vld [vmem:[#allocation2] sm:$0x3] }
 0x24d   : > { %v1280_v43 = vadd.f32 %v1591_v42, %v1272_v41 }
 0x24f   : > { %v1281_v45 = vmax.f32 %v1280_v43, 0.0 }
 0x251   : > { %v1282_v47 = vpack.c.bf16 %v1281_v45, %v1281_v45 }
 0x253   : > { %1653 = vmatmul.mubr.bf16.vlgmr.msra.gmra.mrb[0].mxu0 %v1282_v47 }
 0x326   : > { %v1388_v50 = vpop.f32.mrb[0].mxu0 }
 0x327   : > { %v1389_v51 = vadd.f32 %v1592_v48, %v1388_v50  ;;  %v1654_v52 = vpop.f32.mrb[1].mxu0 }
 0x328   : > { %v1391_v53 = vpop.f32.mrb[2].mxu0 }
 0x329   : > { %v1394_v54 = vmax.f32 %v1389_v51, 0.0  ;;  %v1655_v55 = vpop.f32.mrb[3].mxu0 }
 0x32b   : > { %v1398_v56 = vsel %vm1397_vm3, %v1394_v54, -inf }
 0x32c   : > { %v1400_v57 = vsel %vm1399_vm4, %v1398_v56, -inf }
 0x32d   : > { %1401 = vmax.xlane.f32.xlu0 %v1400_v57 }
 0x3ba   : > { %v1402_v58 = vpop.xlane.xlu0 %1401 }
 0x3bb   : > { %v1403_v59 = vsub.f32 %v1398_v56, %v1402_v58 }
 0x3bd   : > { %v1404_v60 = vmul.f32 1.442695, %v1403_v59 }
 0x3bf   : > { %1866 = vpow2.f32 %v1404_v60 }
 0x3c9   : > { %v1867_v61 = vpop.eup %1866 }
 0x3ca   : > { %v1406_v62 = vsel %vm1399_vm4, %v1867_v61, 0.0 }
 0x3cb   : > { %1407 = vadd.xlane.f32.xlu0 %v1406_v62 }
 0x458   : > { %v1408_v63 = vpop.xlane.xlu0 %1407 }
 0x459   : > { %1868 = vrcp.f32 %v1408_v63 }
 0x463   : > { %v1869_v31 = vpop.eup %1868 }
 0x464   : > { %v1410_v0 = vmul.f32 %v1869_v31, %v1867_v61 }
 0x466   : > { %1411 = vst [vmem:[#allocation6] sm:$0x3] %v1410_v0 }
 0x467 PF: > { %p1681_p4 = scmp.eq.s32.totalorder %s2034_s28, 7  ;;  %s1974_s19 = smov [#allocation6]  }
 0x468   : > { %s1419_s30 = sshll.u32 %s1974_s19, 4  ;;  %s1420_s30 = int_to_ptr.vmem [resolvable:$true] %s1419_s30 }
 0x469   : > { %s1900_s8 = scalar_lea.vmem %s1420_s30, 32  ;;  %p1907_p12 = scmp.lt.s32.totalorder %s1420_s30, %s1420_s30 }
 0x46a   : > { %p1901_p5 = scmp.ne.s32.totalorder %s1420_s30, %s1900_s8  ;;  %p1908_p0 = scmp.lt.s32.totalorder %s1900_s8, %s1900_s8 }
 0x46c   : > { %p1902_p6 = pnand %p1901_p5, %p1681_p4  ;;  %p1909_p1 = por %p1908_p0, %p1907_p12 }
 0x46e   : > { %p1903_p10 = pneg %p1902_p6 }
 0x470   : > { %p1910_p2 = pnand %p1909_p1, %p1903_p10 }
 0x472   : > { %1913 = shalt.err (!%p1910_p2)
}
 0x473   : > { %s1914_s12 = scalar_lea.hbm %s2460_s7, 32 }
 0x474   : > { %p1915_p11 = scmp.ne.s32.totalorder %s2460_s7, %s1914_s12  ;;  %p1920_p9 = scmp.lt.u32.totalorder %s1914_s12, %s2460_s7 }
 0x476   : > { %p1916_p13 = pnand %p1915_p11, %p1681_p4 }
 0x478   : > { %p1917_p3 = pneg %p1916_p13 }
 0x47a   : > { %p1922_p8 = pnand %p1920_p9, %p1917_p3 }
 0x47c   : > { %1925 = shalt.err (!%p1922_p8)
}
 0x47d   : > { %1673 = dma.vmem_to_hbm [thread:$0]  (%p1681_p4), %s1420_s30, 32, %s2460_s7, [#allocation5]  }
 0x47e   : > { %1947 = dma.done.wait (%p1681_p4), [#allocation5], 32  }
 0x47f   : > { %1949 = vsyncadd (%p1681_p4), [#allocation5], 4294967264 }
 0x480 PF: > { %p18_p7 = scmp.ge.s32.totalorder %s2037_s29, 10   ;;  %s2464_s24 = smov %s1956_s25 }
 0x481   : > { %s2465_s25 = smov %s1960_s26  ;;  %s2466_s26 = smov %s2047_s9 }
 0x482   : > { %s2467_s27 = smov %s2037_s29  ;;  %20 = sbr.rel (!%p18_p7) target bundleno = 4 (0x4), region = 96 }
 0x489   :  { %1432 = vsyncpa [#allocation4], 1 }
 0x48a   :  { %1434 = vsyncpa [#allocation4 + $0x1], 1 }
 0x48b   :  { %1435 = vsyncpa [#allocation5], 1 }
 0x48c   :  { %1437 = vsyncpa [#allocation5 + $0x1], 1 }

</bundles_post_ra>
